<compile_context>
chip_gen: v6e
topology: v6e:2x2x1
jax: 0.10.0
libtpu: 0.0.40
codegen_flags: <defaults>
</compile_context>

<pallas_src>
import functools

import jax
import jax.numpy as jnp
import numpy as np
from jax.experimental import pallas as pl
from jax.experimental.pallas import tpu as pltpu


# ---------------------------------------------------------------------------
# One-time probe: pin down pltpu.roll's rotation direction so the shift signs
# below are robust across JAX versions (one tiny extra compile).
# ---------------------------------------------------------------------------
@functools.lru_cache(maxsize=None)
def _roll_is_np_style():
    def probe(x_ref, o_ref):
        o_ref[...] = pltpu.roll(x_ref[...], shift=1, axis=1)

    x = jnp.broadcast_to(jnp.arange(128, dtype=jnp.float32), (8, 128))
    y = pl.pallas_call(
        probe, out_shape=jax.ShapeDtypeStruct((8, 128), jnp.float32))(x)
    # np.roll semantics => y[0, 1] == x[0, 0] == 0.
    return bool(jax.device_get(y)[0, 1] == 0.0)


# ---------------------------------------------------------------------------
# Pallas kernel: one image per grid step.
# Activations: channels-first (C, H*W); lane dim = H*W (dense, >= 128).
# ---------------------------------------------------------------------------
def _aem_kernel(orig_ref, enh_ref,
                w1_ref, b1_ref, w2_ref, b2_ref, w3_ref, b3_ref,
                fw1_ref, fb1_ref, fw2_ref, fb2_ref,
                out_ref, *, H, W, roll_np):
    f32, bf16 = jnp.float32, jnp.bfloat16
    HW = H * W

    # ----- 3x3 "same" conv machinery: 9 tap offsets + in-kernel validity masks.
    taps = [(dy, dx) for dy in (-1, 0, 1) for dx in (-1, 0, 1)]
    lane = jax.lax.broadcasted_iota(jnp.int32, (1, HW), 1)
    wp = lane % W
    hp = lane // W
    masks = []
    for dy, dx in taps:
        ok = (hp + dy >= 0) & (hp + dy < H) & (wp + dx >= 0) & (wp + dx < W)
        masks.append(ok.astype(bf16))                     # (1, HW) 0/1

    def shift(x, k):
        # y[:, i] = x[:, i + k]; wrap positions are zeroed by the tap mask.
        if k == 0:
            return x
        s = (-k) % HW if roll_np else k % HW
        return pltpu.roll(x, shift=s, axis=1)

    def conv3x3(x, w_ref, b_ref):
        # x: (cin, HW) f32.  w_ref: (cout, 9*cin) bf16 with tap-major columns.
        planes = []
        for t, (dy, dx) in enumerate(taps):
            k = dy * W + dx
            p = shift(x, k).astype(bf16)
            if k != 0:
                p = p * masks[t]
            planes.append(p)
        stacked = jnp.concatenate(planes, axis=0)          # (9*cin, HW) bf16
        # One fused MXU matmul per layer (bf16 operands, f32 accumulation) + bias.
        return jnp.dot(w_ref[...], stacked,
                       preferred_element_type=f32) + b_ref[...]

    orig = orig_ref[0]                                     # (3, HW) f32
    enh = enh_ref[0]                                       # (3, HW) f32

    x_in = jnp.concatenate([orig, enh], axis=0)            # (6, HW)
    h1 = jnp.maximum(conv3x3(x_in, w1_ref, b1_ref), 0.0)   # (16, HW)
    feat = jnp.maximum(conv3x3(h1, w2_ref, b2_ref), 0.0)   # (16, HW)
    residual = conv3x3(feat, w3_ref, b3_ref)               # (3, HW)

    # ----- GAP (from the f32 accumulator) -> tiny MLP -> gates (VPU/XLU/EUP).
    pooled = jnp.mean(feat, axis=1, keepdims=True)                        # (16, 1)
    p = jnp.maximum(jnp.sum(fw1_ref[...] * pooled, axis=0, keepdims=True)
                    + fb1_ref[...], 0.0)                                  # (1, 8)
    s = jax.nn.sigmoid(jnp.sum(fw2_ref[...] * p, axis=1, keepdims=True)
                       + fb2_ref[...])                                    # (2, 1)
    contrast = 0.5 + s[0:1, :] * 1.5                                      # (1, 1)
    saturation = 0.5 + s[1:2, :] * 1.5                                    # (1, 1)

    # ----- Enhancement tail on the full (3, HW) plane; single unmasked store.
    e = enh + residual
    mean = jnp.mean(e, axis=1, keepdims=True)                             # (3, 1)
    e = (e - mean) * contrast + mean
    lum = 0.299 * e[0:1] + 0.587 * e[1:2] + 0.114 * e[2:3]                # (1, HW)
    e = lum + saturation * (e - lum)
    out_ref[0] = jnp.clip(e, 0.0, 1.0)


# ---------------------------------------------------------------------------
# Wrapper: NCHW in / NCHW out (PyTorch convention). Pure reshapes only.
# ---------------------------------------------------------------------------
def adaptive_enhancement(original_nchw, enhanced_nchw, params):
    (w1, b1, w2, b2, w3, b3, fw1, fb1, fw2, fb2) = params
    B, C, H, W = original_nchw.shape
    assert C == 3 and enhanced_nchw.shape == original_nchw.shape
    HW = H * W

    orig = original_nchw.astype(jnp.float32).reshape(B, 3, HW)
    enh = enhanced_nchw.astype(jnp.float32).reshape(B, 3, HW)

    # Conv weights HWIO (3,3,cin,cout) -> fused (cout, 9*cin) bf16; column order
    # t*cin + ci with t = ky*3 + kx, matching the in-kernel tap stacking.
    def conv_w(w):
        cout, cin = w.shape[3], w.shape[2]
        return jnp.transpose(w, (3, 0, 1, 2)).reshape(cout, 9 * cin).astype(jnp.bfloat16)

    w1f, w2f, w3f = conv_w(w1), conv_w(w2), conv_w(w3)
    b1c = b1.reshape(-1, 1).astype(jnp.float32)      # (16, 1)
    b2c = b2.reshape(-1, 1).astype(jnp.float32)      # (16, 1)
    b3c = b3.reshape(-1, 1).astype(jnp.float32)      # (3, 1)
    fw1c = fw1.astype(jnp.float32)                   # (16, 8)
    fb1c = fb1.reshape(1, -1).astype(jnp.float32)    # (1, 8)
    fw2c = fw2.T.astype(jnp.float32)                 # (2, 8)
    fb2c = fb2.reshape(-1, 1).astype(jnp.float32)    # (2, 1)

    full = lambda a: pl.BlockSpec(a.shape, lambda b: (0,) * a.ndim)
    img = pl.BlockSpec((1, 3, HW), lambda b: (b, 0, 0))

    kernel = functools.partial(_aem_kernel, H=H, W=W, roll_np=_roll_is_np_style())

    out = pl.pallas_call(
        kernel,
        out_shape=jax.ShapeDtypeStruct((B, 3, HW), jnp.float32),
        grid_spec=pltpu.PrefetchScalarGridSpec(
            num_scalar_prefetch=0,
            grid=(B,),
            in_specs=[
                img, img,                              # original, enhanced
                full(w1f), full(b1c),
                full(w2f), full(b2c),
                full(w3f), full(b3c),
                full(fw1c), full(fb1c), full(fw2c), full(fb2c),
            ],
            out_specs=img,
        ),
        compiler_params=pltpu.CompilerParams(
            dimension_semantics=("parallel",)),
    )(orig, enh, w1f, b1c, w2f, b2c, w3f, b3c, fw1c, fb1c, fw2c, fb2c)

    return out.reshape(B, 3, H, W)


# ---------------------------------------------------------------------------
# Pure-JAX reference (mirrors the PyTorch forward; convs use the same bf16
# operands / f32 accumulation as the kernel's MXU path).
# ---------------------------------------------------------------------------
def reference_forward(original, enhanced, params):
    (w1, b1, w2, b2, w3, b3, fw1, fb1, fw2, fb2) = params
    bf16 = jnp.bfloat16
    hi = jax.lax.Precision.HIGHEST

    def conv(x, w_hwio, b):
        w = jnp.transpose(w_hwio, (3, 2, 0, 1)).astype(bf16)   # HWIO -> OIHW
        y = jax.lax.conv_general_dilated(
            x.astype(bf16), w, window_strides=(1, 1), padding='SAME',
            dimension_numbers=('NCHW', 'OIHW', 'NCHW'),
            preferred_element_type=jnp.float32)
        return y + b.reshape(1, -1, 1, 1)

    x = jnp.concatenate([original, enhanced], axis=1)
    h1 = jax.nn.relu(conv(x, w1, b1))
    feat = jax.nn.relu(conv(h1, w2, b2))
    residual = conv(feat, w3, b3)
    pooled = feat.mean(axis=(2, 3))
    p = jax.nn.relu(jnp.dot(pooled, fw1, precision=hi) + fb1)
    p = jax.nn.sigmoid(jnp.dot(p, fw2, precision=hi) + fb2)
    contrast = (0.5 + p[:, 0:1] * 1.5)[:, :, None, None]
    saturation = (0.5 + p[:, 1:2] * 1.5)[:, :, None, None]
    enh = enhanced + residual
    mean = enh.mean(axis=(2, 3), keepdims=True)
    enh = (enh - mean) * contrast + mean
    lum = 0.299 * enh[:, 0:1] + 0.587 * enh[:, 1:2] + 0.114 * enh[:, 2:3]
    enh = lum + saturation * (enh - lum)
    return jnp.clip(enh, 0.0, 1.0)


# ---------------------------------------------------------------------------
def make_params():
    # Deterministic synthetic parameters (no checkpoint loading).
    k = jax.random.split(jax.random.PRNGKey(42), 10)
    w1 = jax.random.normal(k[0], (3, 3, 6, 16), jnp.float32) * 0.10
    b1 = jax.random.normal(k[1], (16,), jnp.float32) * 0.05
    w2 = jax.random.normal(k[2], (3, 3, 16, 16), jnp.float32) * 0.08
    b2 = jax.random.normal(k[3], (16,), jnp.float32) * 0.05
    w3 = jax.random.normal(k[4], (3, 3, 16, 3), jnp.float32) * 0.08
    b3 = jax.random.normal(k[5], (3,), jnp.float32) * 0.05
    fw1 = jax.random.normal(k[6], (16, 8), jnp.float32) * 0.20
    fb1 = jax.random.normal(k[7], (8,), jnp.float32) * 0.05
    fw2 = jax.random.normal(k[8], (8, 2), jnp.float32) * 0.20
    fb2 = jax.random.normal(k[9], (2,), jnp.float32) * 0.05
    return (w1, b1, w2, b2, w3, b3, fw1, fb1, fw2, fb2)


if __name__ == "__main__":
    B, C, H, W = 2, 3, 16, 16
    key = jax.random.PRNGKey(0)
    k_orig, k_enh = jax.random.split(key)
    original = jax.random.uniform(k_orig, (B, C, H, W), jnp.float32)
    enhanced = jax.random.uniform(k_enh, (B, C, H, W), jnp.float32)
    params = make_params()

    out = jax.block_until_ready(adaptive_enhancement(original, enhanced, params))
    ref = jax.block_until_ready(reference_forward(original, enhanced, params))

    np.testing.assert_allclose(np.asarray(out), np.asarray(ref),
                               atol=3e-3, rtol=3e-3)
    assert out.shape == (B, C, H, W)
    print("KERNEL_OK")
</pallas_src>

<mosaic_0001>
module attributes {stable_mosaic.version = 11 : i64} {
  func.func @probe(%arg0: memref<8x128xf32, #tpu.memory_space<vmem>>, %arg1: memref<8x128xf32, #tpu.memory_space<vmem>>) attributes {dimension_semantics = [], scalar_prefetch = 0 : i64, scratch_operands = 0 : i64, tpu.core_type = #tpu.core_type<tc>} {
    %c0 = arith.constant 0 : index
    %c0_0 = arith.constant 0 : index
    %0 = vector.load %arg0[%c0, %c0_0] : memref<8x128xf32, #tpu.memory_space<vmem>>, vector<8x128xf32>
    %c1_i32 = arith.constant 1 : i32
    %1 = tpu.dynamic_rotate %0 by %c1_i32 dim 1 : vector<8x128xf32>, i32 -> vector<8x128xf32>
    %c0_1 = arith.constant 0 : index
    %c0_2 = arith.constant 0 : index
    %2 = vector.load %arg1[%c0_1, %c0_2] : memref<8x128xf32, #tpu.memory_space<vmem>>, vector<8x128xf32>
    tpu.vector_store %arg1[%c0_1, %c0_2], %1 {strides = array<i32>} : memref<8x128xf32, #tpu.memory_space<vmem>>, vector<8x128xf32>,
    return
  }
}

</mosaic_0001>

<bundles_post_ra>
// kernel: tpu_custom_call.1
= control target key start
LH: loop header
LB: loop body
LE: loop exit
PB: predicated region body
PF: predicated region fallthrough
CT: control target
= control target key end

     0   :  { %6 = vsyncpa [#allocation3], 0  ;;  %s106_s0 = inlined_call_operand.hbm [shape: f32[8,128], index: 0, kind: input, shape index: {}]   ;;  %s107_s1 = inlined_call_operand.hbm [shape: f32[8,128], index: 1, kind: output, shape index: {}]  }
   0x1   :  { %7 = vsyncpa [#allocation4], 0  ;;  %s87_s6 = smov [#allocation2]  }
   0x2   :  { %s14_s7 = sshll.u32 %s87_s6, 4  ;;  %s15_s7 = int_to_ptr.vmem [resolvable:$true] %s14_s7 }
   0x3   :  { %s51_s8 = scalar_lea.vmem %s15_s7, 128  ;;  %p56_p1 = scmp.lt.s32.totalorder %s15_s7, %s15_s7 }
   0x4   :  { %p52_p0 = scmp.ne.s32.totalorder %s15_s7, %s51_s8  ;;  %p57_p2 = scmp.lt.s32.totalorder %s51_s8, %s51_s8 }
   0x6   :  { %p58_p3 = por %p57_p2, %p56_p1 }
   0x8   :  { %p59_p4 = pnand %p58_p3, %p52_p0 }
   0xa   :  { %62 = shalt.err (!%p59_p4)
}
   0xb   :  { %17 = dma.hbm_to_vmem [thread:$0]  %s106_s0, 128, %s15_s7, [#allocation3]  }
   0xc   :  { %83 = dma.done.wait [#allocation3], 128  }
   0xd   :  { %84 = vsyncadd [#allocation3], 4294967168  ;;  %v21_v0 = vld [vmem:[#allocation2] sm:$0xff]  ;;  %s88_s11 = smov 1   ;;  %s89_s12 = smov [#allocation5]  }
   0xe   :  { %22 = vrot.lane.b32.xlu0 %v21_v0, %s88_s11  ;;  %s31_s13 = sshll.u32 %s89_s12, 4  ;;  %s32_s13 = int_to_ptr.vmem [resolvable:$true] %s31_s13 }
   0xf   :  { %s63_s14 = scalar_lea.vmem %s32_s13, 128  ;;  %p68_p6 = scmp.lt.s32.totalorder %s32_s13, %s32_s13 }
  0x10   :  { %p64_p5 = scmp.ne.s32.totalorder %s32_s13, %s63_s14  ;;  %p69_p7 = scmp.lt.s32.totalorder %s63_s14, %s63_s14 }
  0x12   :  { %p70_p8 = por %p69_p7, %p68_p6 }
  0x14   :  { %p71_p9 = pnand %p70_p8, %p64_p5 }
  0x80   :  { %v23_v1 = vpop.permute.xlu0 %22 }
  0x81   :  { %24 = vst [vmem:[#allocation5] sm:$0xff] %v23_v1 }
  0x82   :  { %74 = shalt.err (!%p71_p9)
}
  0x83   :  { %34 = dma.vmem_to_hbm [thread:$0]  %s32_s13, 128, %s107_s1, [#allocation4]  }
  0x84   :  { %85 = dma.done.wait [#allocation4], 128  }
  0x85   :  { %86 = vsyncadd [#allocation4], 4294967168 }
  0x86   :  { %38 = vsyncpa [#allocation3], 1 }
  0x87   :  { %39 = vsyncpa [#allocation4], 1 }

</bundles_post_ra>
